<compile_context>
chip_gen: v7x
topology: tpu7x:2x2x1
jax: 0.10.0
libtpu: 0.0.40
codegen_flags: <defaults>
</compile_context>

<pallas_src>
import functools
import math
from typing import NamedTuple

import jax
import jax.numpy as jnp
from jax.experimental import pallas as pl
from jax.experimental.pallas import tpu as pltpu


def _round_up(v, m):
    return ((v + m - 1) // m) * m


def _cdiv(a, b):
    return -(-a // b)


def _choose_tile(dim, cap, align):
    """Tile size for `dim`.

    If the whole dim fits under `cap`, use it directly (a block dim equal to
    the full array dim is exempt from the (8,128) rule -> no padding).
    Otherwise pick an `align`-multiple close to dim/ceil(dim/cap), so padding
    is at most one align unit per tile (avoids the round-up-to-cap blow-up).
    """
    if dim <= cap:
        return dim, dim
    n_blocks = _cdiv(dim, cap)
    tile = _round_up(_cdiv(dim, n_blocks), align)
    padded = _round_up(dim, tile)
    return tile, padded


class _Meta(NamedTuple):
    in_features: int
    out_features: int
    num_outputs: int
    fused_n: int        # K * F_out
    f_in_p: int         # padded reduction dim stored inside w_fused
    n_p: int            # padded fused-N dim stored inside w_fused
    tk: int
    tn: int
    compute_dtype: str  # dtype name (hashable -> usable as a static jit arg)


def fuse_multidense_params(weights, biases, *, tn_cap=512, tk_cap=512,
                           compute_dtype=None):
    """One-time fusion of the K parallel dense heads.

    weights: (K, F_in, F_out) — already the transpose of PyTorch nn.Linear's
             (F_out, F_in) weight, so the kernel computes x @ W_k directly.
             (Loading a real checkpoint requires a per-head transpose.)
    biases:  (K, F_out)

    All transpose / reshape / pad HBM copies of the weights happen HERE,
    never in the per-forward path.
    """
    K, F_in, F_out = weights.shape
    N = K * F_out
    if compute_dtype is None:
        compute_dtype = weights.dtype
    compute_dtype = jnp.dtype(compute_dtype)

    tk, f_in_p = _choose_tile(F_in, tk_cap, 128)
    tn, n_p = _choose_tile(N, tn_cap, 128)

    # (K, F_in, F_out) -> (F_in, K*F_out): one wide-N matmul for all heads.
    w_fused = jnp.transpose(weights, (1, 0, 2)).reshape(F_in, N).astype(compute_dtype)
    b_fused = biases.reshape(1, N).astype(jnp.float32)
    if (f_in_p, n_p) != (F_in, N):
        w_fused = jnp.pad(w_fused, ((0, f_in_p - F_in), (0, n_p - N)))
        b_fused = jnp.pad(b_fused, ((0, 0), (0, n_p - N)))

    meta = _Meta(F_in, F_out, K, N, f_in_p, n_p, tk, tn, compute_dtype.name)
    return w_fused, b_fused, meta


# ---------------------------------------------------------------------------
# Kernels
# ---------------------------------------------------------------------------

def _resident_kernel(x_ref, w_ref, b_ref, o_ref):
    # Weights/bias are full-array blocks with constant index_maps: DMA'd once,
    # then stay VMEM-resident while batch tiles stream past (x/out roofline).
    acc = jnp.dot(x_ref[...], w_ref[...], preferred_element_type=jnp.float32)
    o_ref[...] = (acc + b_ref[...]).astype(o_ref.dtype)


def _tiled_kernel(x_ref, w_ref, b_ref, o_ref, acc_ref):
    k = pl.program_id(2)

    @pl.when(k == 0)
    def _():
        # Bias-initialize the accumulator: removes the extra VALU pass that a
        # "+ bias" in the epilogue would cost (bias tile is already resident).
        acc_ref[...] = jnp.broadcast_to(b_ref[...], acc_ref.shape)

    acc_ref[...] += jnp.dot(x_ref[...], w_ref[...],
                            preferred_element_type=jnp.float32)

    @pl.when(k == pl.num_programs(2) - 1)
    def _():
        o_ref[...] = acc_ref[...].astype(o_ref.dtype)


# ---------------------------------------------------------------------------
# Forward
# ---------------------------------------------------------------------------

# Conservative: fits v5e's 16 MiB scoped-VMEM default; well inside v6e (32 MiB
# default / 128 MiB phys) and v7x (32 MiB default / 64 MiB phys).
_RESIDENT_VMEM_BUDGET = 12 * 1024 * 1024


@functools.partial(jax.jit, static_argnames=("meta", "tm_cap"))
def _multidense_fused(x, w_fused, b_fused, *, meta, tm_cap=256):
    B, F_in = x.shape
    assert F_in == meta.in_features, "x feature dim mismatch"
    out_dtype = x.dtype
    compute_dtype = jnp.dtype(meta.compute_dtype)
    f_in_p, n_p, tk, tn = meta.f_in_p, meta.n_p, meta.tk, meta.tn

    # Batch tiling.  Small batches use a single full-dim block (exempt from
    # the (8,128) rule -> no padding).  For B >= 16, force >= 2 blocks along
    # the "parallel" axis so both v7x TensorCores get work.
    if B <= 16 and B <= tm_cap:
        tm, b_p = B, B
    else:
        cap = min(tm_cap, max(8, _round_up(_cdiv(B, 2), 8)))
        tm, b_p = _choose_tile(B, cap, 8)

    x_p = x.astype(compute_dtype)
    if (b_p, f_in_p) != (B, F_in):
        # Zero-fill: padded reduction columns contribute 0; padded rows sliced off.
        x_p = jnp.pad(x_p, ((0, b_p - B), (0, f_in_p - F_in)))

    itemsize = jnp.dtype(compute_dtype).itemsize
    w_bytes = w_fused.size * w_fused.dtype.itemsize
    b_bytes = b_fused.size * b_fused.dtype.itemsize
    cost = pl.CostEstimate(
        flops=2 * b_p * f_in_p * n_p,
        transcendentals=0,
        bytes_accessed=(x_p.size * itemsize + w_bytes + b_bytes
                        + b_p * n_p * jnp.dtype(out_dtype).itemsize),
    )

    # Weight-resident schedule if the fused slab (counted twice for the
    # pipeliner's buffering) + double-buffered x/out tiles fits the budget.
    resident_bytes = (2 * (w_bytes + b_bytes)
                      + 2 * tm * f_in_p * itemsize
                      + 2 * tm * n_p * jnp.dtype(out_dtype).itemsize)

    if resident_bytes <= _RESIDENT_VMEM_BUDGET:
        out_p = pl.pallas_call(
            _resident_kernel,
            out_shape=jax.ShapeDtypeStruct((b_p, n_p), out_dtype),
            grid_spec=pltpu.PrefetchScalarGridSpec(
                num_scalar_prefetch=0,
                grid=(b_p // tm,),
                in_specs=[
                    pl.BlockSpec((tm, f_in_p), lambda i: (i, 0)),   # x: streamed
                    pl.BlockSpec((f_in_p, n_p), lambda i: (0, 0)),  # w: resident
                    pl.BlockSpec((1, n_p), lambda i: (0, 0)),       # b: resident
                ],
                out_specs=pl.BlockSpec((tm, n_p), lambda i: (i, 0)),
            ),
            compiler_params=pltpu.CompilerParams(
                dimension_semantics=("parallel",),
            ),
            cost_estimate=cost,
        )(x_p, w_fused, b_fused)
    else:
        out_p = pl.pallas_call(
            _tiled_kernel,
            out_shape=jax.ShapeDtypeStruct((b_p, n_p), out_dtype),
            grid_spec=pltpu.PrefetchScalarGridSpec(
                num_scalar_prefetch=0,
                grid=(b_p // tm, n_p // tn, f_in_p // tk),
                in_specs=[
                    pl.BlockSpec((tm, tk), lambda i, j, k: (i, k)),  # x
                    pl.BlockSpec((tk, tn), lambda i, j, k: (k, j)),  # fused weights
                    pl.BlockSpec((1, tn), lambda i, j, k: (0, j)),   # fused bias
                ],
                out_specs=pl.BlockSpec((tm, tn), lambda i, j, k: (i, j)),
                scratch_shapes=[pltpu.VMEM((tm, tn), jnp.float32)],
            ),
            compiler_params=pltpu.CompilerParams(
                dimension_semantics=("parallel", "parallel", "arbitrary"),
            ),
            cost_estimate=cost,
        )(x_p, w_fused, b_fused)

    if (b_p, n_p) != (B, meta.fused_n):
        out_p = out_p[:B, :meta.fused_n]
    return out_p


def multidense_forward(x, w_fused, b_fused, meta):
    """Fused forward: returns a (B, K, F_out) array (head-major view of the
    lane-dense fused slab).  No per-head split copies."""
    out = _multidense_fused(x, w_fused, b_fused, meta=meta)
    return out.reshape(x.shape[0], meta.num_outputs, meta.out_features)


def multidense_forward_list(x, w_fused, b_fused, meta):
    """Strict parity with MultiDense.forward (list of K (B, F_out) tensors).
    Prefer multidense_forward unless callers truly need separate arrays."""
    out = multidense_forward(x, w_fused, b_fused, meta)
    return [out[:, k, :] for k in range(meta.num_outputs)]


def init_multidense_params(key, in_features, out_features, num_outputs,
                           dtype=jnp.float32):
    """nn.Linear-style init: U(-1/sqrt(fan_in), 1/sqrt(fan_in)) per head."""
    bound = 1.0 / math.sqrt(in_features)
    kw, kb = jax.random.split(key)
    weights = jax.random.uniform(
        kw, (num_outputs, in_features, out_features), dtype,
        minval=-bound, maxval=bound)
    biases = jax.random.uniform(
        kb, (num_outputs, out_features), dtype, minval=-bound, maxval=bound)
    return weights, biases


if __name__ == "__main__":
    # Small shapes consistent with the module: batch=8, in_features=32,
    # out_features=64, num_outputs=3 parallel dense heads.
    B, F_in, F_out, K = 8, 32, 64, 3

    key = jax.random.PRNGKey(0)
    kx, kp = jax.random.split(key)
    x = jax.random.normal(kx, (B, F_in), dtype=jnp.float32)
    weights, biases = init_multidense_params(kp, F_in, F_out, K)

    # One-time fusion (init / param-update time, NOT per forward call).
    # compute_dtype=jnp.bfloat16 would feed the MXU its native input type
    # (with f32 accumulation); the demo keeps f32 for an exact check.
    w_fused, b_fused, meta = fuse_multidense_params(weights, biases)

    out = multidense_forward(x, w_fused, b_fused, meta)          # (B, K, F_out)
    out = jax.block_until_ready(out)
    outs = multidense_forward_list(x, w_fused, b_fused, meta)    # list API parity
    outs = [jax.block_until_ready(o) for o in outs]

    for k in range(K):
        ref = x @ weights[k] + biases[k]
        assert outs[k].shape == (B, F_out), f"bad shape for head {k}: {outs[k].shape}"
        assert jnp.allclose(outs[k], ref, atol=1e-5, rtol=1e-5), f"mismatch head {k}"
        assert jnp.allclose(out[:, k, :], ref, atol=1e-5, rtol=1e-5), f"mismatch head {k}"

    print("KERNEL_OK")
</pallas_src>

<mosaic_0001>
module attributes {stable_mosaic.version = 11 : i64} {
  func.func @_resident_kernel(%arg0: i32, %arg1: memref<8x32xf32, #tpu.memory_space<vmem>>, %arg2: memref<32x192xf32, #tpu.memory_space<vmem>>, %arg3: memref<1x192xf32, #tpu.memory_space<vmem>>, %arg4: memref<8x192xf32, #tpu.memory_space<vmem>>) attributes {dimension_semantics = [#tpu.dimension_semantics<parallel>], iteration_bounds = array<i64: 1>, scalar_prefetch = 0 : i64, scratch_operands = 0 : i64, tpu.core_type = #tpu.core_type<tc>, window_params = [{transform_indices = @transform_0, window_bounds = array<i64: 8, 32>}, {pipeline_mode = #tpu.pipeline_mode<synchronous>, transform_indices = @transform_1, window_bounds = array<i64: 32, 192>}, {pipeline_mode = #tpu.pipeline_mode<synchronous>, transform_indices = @transform_2, window_bounds = array<i64: 1, 192>}, {transform_indices = @transform_3, window_bounds = array<i64: 8, 192>}]} {
    %c0 = arith.constant 0 : index
    %c0_0 = arith.constant 0 : index
    %0 = vector.load %arg1[%c0, %c0_0] : memref<8x32xf32, #tpu.memory_space<vmem>>, vector<8x32xf32>
    %c0_1 = arith.constant 0 : index
    %c0_2 = arith.constant 0 : index
    %1 = vector.load %arg2[%c0_1, %c0_2] : memref<32x192xf32, #tpu.memory_space<vmem>>, vector<32x192xf32>
    %cst = arith.constant dense<0.000000e+00> : vector<8x192xf32>
    %2 = tpu.matmul %0, %1, %cst {dimension_numbers = #tpu.dot_dimension_numbers<[1], [0], [0], [1], [0, 0, 1, 1], [], []>} : vector<8x32xf32>, vector<32x192xf32>, vector<8x192xf32> -> vector<8x192xf32>
    %c0_3 = arith.constant 0 : index
    %c0_4 = arith.constant 0 : index
    %3 = vector.load %arg3[%c0_3, %c0_4] : memref<1x192xf32, #tpu.memory_space<vmem>>, vector<1x192xf32>
    %4 = vector.broadcast %3 : vector<1x192xf32> to vector<8x192xf32>
    %5 = arith.addf %2, %4 : vector<8x192xf32>
    %c0_5 = arith.constant 0 : index
    %c0_6 = arith.constant 0 : index
    %6 = vector.load %arg4[%c0_5, %c0_6] : memref<8x192xf32, #tpu.memory_space<vmem>>, vector<8x192xf32>
    tpu.vector_store %arg4[%c0_5, %c0_6], %5 {strides = array<i32>} : memref<8x192xf32, #tpu.memory_space<vmem>>, vector<8x192xf32>,
    return
  }
  func.func @transform_0(%arg0: i32) -> (i32, i32) {
    %c0_i32 = arith.constant 0 : i32
    %c0_i32_0 = arith.constant 0 : i32
    return %arg0, %c0_i32 : i32, i32
  }
  func.func @transform_1(%arg0: i32) -> (i32, i32) {
    %c0_i32 = arith.constant 0 : i32
    %c0_i32_0 = arith.constant 0 : i32
    %c0_i32_1 = arith.constant 0 : i32
    return %c0_i32, %c0_i32_0 : i32, i32
  }
  func.func @transform_2(%arg0: i32) -> (i32, i32) {
    %c0_i32 = arith.constant 0 : i32
    %c0_i32_0 = arith.constant 0 : i32
    %c0_i32_1 = arith.constant 0 : i32
    return %c0_i32, %c0_i32_0 : i32, i32
  }
  func.func @transform_3(%arg0: i32) -> (i32, i32) {
    %c0_i32 = arith.constant 0 : i32
    %c0_i32_0 = arith.constant 0 : i32
    return %arg0, %c0_i32 : i32, i32
  }
}

</mosaic_0001>

<bundles_post_ra>
// kernel: _multidense_fused.1
= control target key start
LH: loop header
LB: loop body
LE: loop exit
PB: predicated region body
PF: predicated region fallthrough
CT: control target
= control target key end

     0   :  { %8 = vsyncpa [#allocation3], 0  ;;  %s315_s0 = inlined_call_operand.hbm [shape: f32[8,32], index: 0, kind: input, shape index: {}]   ;;  %s316_s1 = inlined_call_operand.hbm [shape: f32[32,192], index: 1, kind: input, shape index: {}]   ;;  %s317_s2 = inlined_call_operand.vmem [shape: f32[1,192], index: 2, kind: input, shape index: {}]   ;;  %s318_s3 = inlined_call_operand.hbm [shape: f32[8,192], index: 3, kind: output, shape index: {}]  }
   0x1   :  { %9 = vsyncpa [#allocation6], 0 }
   0x2   :  { %10 = vsyncpa [#allocation4], 0  ;;  %s243_s12 = smov [#allocation2]   ;;  %s244_s14 = smov [#allocation5]  }
   0x3   :  { %s17_s13 = sshll.u32 %s243_s12, 4  ;;  %s26_s15 = sshll.u32 %s244_s14, 4  ;;  %s18_s13 = int_to_ptr.vmem [resolvable:$true] %s17_s13  ;;  %s269_s15 = int_to_ptr.vmem [resolvable:$true] %s26_s15 }
   0x4   :  { %s171_s18 = scalar_lea.hbm %s315_s0, 128 }
   0x5   :  { %p172_p0 = scmp.ne.s32.totalorder %s315_s0, %s171_s18  ;;  %p175_p1 = scmp.lt.u32.totalorder %s171_s18, %s315_s0 }
   0x7   :  { %p177_p2 = pnand %p175_p1, %p172_p0 }
   0x9   :  { %180 = shalt.err (!%p177_p2)
}
   0xa   :  { %s181_s23 = scalar_lea.vmem %s18_s13, 128  ;;  %p186_p4 = scmp.lt.s32.totalorder %s18_s13, %s18_s13 }
   0xb   :  { %p182_p3 = scmp.ne.s32.totalorder %s18_s13, %s181_s23  ;;  %p187_p5 = scmp.lt.s32.totalorder %s181_s23, %s181_s23 }
   0xd   :  { %p188_p6 = por %p187_p5, %p186_p4 }
   0xf   :  { %p189_p7 = pnand %p188_p6, %p182_p3 }
  0x11   :  { %192 = shalt.err (!%p189_p7)
}
  0x12   :  { %20 = dma.hbm_to_vmem [thread:$0]  %s315_s0, 128, %s18_s13, [#allocation3]  }
  0x13   :  { %s193_s28 = scalar_lea.hbm %s316_s1, 1024 }
  0x14   :  { %p194_p8 = scmp.ne.s32.totalorder %s316_s1, %s193_s28  ;;  %p197_p9 = scmp.lt.u32.totalorder %s193_s28, %s316_s1 }
  0x16   :  { %p199_p10 = pnand %p197_p9, %p194_p8 }
  0x18   :  { %202 = shalt.err (!%p199_p10)
}
  0x19   :  { %s203_s6 = scalar_lea.vmem %s269_s15, 1024  ;;  %p208_p12 = scmp.lt.s32.totalorder %s269_s15, %s269_s15 }
  0x1a   :  { %p204_p11 = scmp.ne.s32.totalorder %s269_s15, %s203_s6  ;;  %p209_p13 = scmp.lt.s32.totalorder %s203_s6, %s203_s6 }
  0x1c   :  { %p210_p0 = por %p209_p13, %p208_p12 }
  0x1e   :  { %p211_p1 = pnand %p210_p0, %p204_p11 }
  0x20   :  { %214 = shalt.err (!%p211_p1)
}
  0x21   :  { %s245_s0 = smov 256   ;;  %s246_s7 = smov 16  }
  0x22   :  { %32 = dma.hbm_to_vmem [thread:$0]  %s316_s1, 1024, %s269_s15, [#allocation6], %s245_s0, %s245_s0, %s246_s7  }
  0x23   :  { %237 = dma.done.wait [#allocation3], 128  }
  0x24   :  { %238 = vsyncadd [#allocation3], 4294967168 }
  0x25   :  { %239 = dma.done.wait [#allocation6], 1024  }
  0x26   :  { %240 = vsyncadd [#allocation6], 4294966272  ;;  %v247_v0 = vmov 0.0   ;;  %v43_v1 = vld [vmem:[#allocation5 + $0x8] sm:$0xff]  ;;  %v45_v2 = vld [vmem:[#allocation5 + $0x18] sm:$0xff]  ;;  %vm62_vm0 = vcmask 261120   ;;  %v52_v14 = vlaneseq }
  0x27   :  { %130 = vmatprep.mubr.f32.mxu0 %v247_v0  ;;  %v42_v3 = vld [vmem:[#allocation5] sm:$0xff]  ;;  %v157_v4 = vpack.c.bf16 %v45_v2, %v43_v1  ;;  %v44_v5 = vld [vmem:[#allocation5 + $0x10] sm:$0xff]  ;;  %v47_v6 = vld [vmem:[#allocation5 + $0x28] sm:$0xff]  ;;  %s248_s11 = smov [#allocation7]   ;;  %vm138_vm1 = vcmask 523264  }
  0x28   :  { %v49_v7 = vld [vmem:[#allocation5 + $0x38] sm:$0xff]  ;;  %v159_v8 = vpack.c.bf16 %v44_v5, %v42_v3  ;;  %v46_v10 = vld [vmem:[#allocation5 + $0x20] sm:$0xff]  ;;  %v48_v11 = vld [vmem:[#allocation5 + $0x30] sm:$0xff]  ;;  %v53_v15 = vshrl.u32 %v52_v14, 7  ;;  %s146_s12 = sshll.u32 %s248_s11, 4  ;;  %s147_s12 = int_to_ptr.vmem [resolvable:$true] %s146_s12 }
  0x29   :  { %v161_v9 = vpack.c.bf16 %v49_v7, %v47_v6  ;;  %158 = vmatprep.subr.bf16.mxu0 %v157_v4  ;;  %v163_v12 = vpack.c.bf16 %v48_v11, %v46_v10  ;;  %v41_v13 = vld [vmem:[#allocation2] sm:$0xff]  ;;  %s215_s13 = scalar_lea.vmem %s147_s12, 256  ;;  %p220_p3 = scmp.lt.s32.totalorder %s147_s12, %s147_s12 }
  0x2a   :  { %160 = vmatpush1.bf16.msra.mxu0 %v159_v8  ;;  %v54_v16 = vsub.s32 0, %v53_v15  ;;  %v50_v17 = vld [vmem:[%s317_s2] sm:$0x3]  ;;  %v58_v18 = vsub.s32 1, %v53_v15  ;;  %p216_p2 = scmp.ne.s32.totalorder %s147_s12, %s215_s13  ;;  %p221_p4 = scmp.lt.s32.totalorder %s215_s13, %s215_s13 }
  0x2b   :  { %162 = vmatprep.subr.bf16.mxu0 %v161_v9 }
  0x2c   :  { %v55_v19 = vrot.slane %v50_v17, %v54_v16  ;;  %v59_v20 = vrot.slane %v50_v17, %v58_v18  ;;  %p222_p5 = por %p221_p4, %p220_p3 }
  0x2e   :  { %164 = vmatpush1.bf16.msra.mxu0 %v163_v12  ;;  %p223_p6 = pnand %p222_p5, %p216_p2 }
  0x31   :  { %156 = vmatmul.mubr.msk.f32.vlgmr.msra.gmra.mrb[0].mxu0 %vm62_vm0, %v41_v13 }
 0x104   :  { %v132_v21 = vpop.f32.mrb[0].mxu0 }
 0x105   :  { %v133_v22 = vadd.f32 %v132_v21, %v55_v19  ;;  %v134_v23 = vpop.f32.mrb[1].mxu0 }
 0x106   :  { %v135_v24 = vadd.f32 %v134_v23, %v59_v20 }
 0x107   :  { %137 = vst [vmem:[#allocation7] sm:$0xff] %v133_v22 }
 0x108   :  { %139 = vst.msk [vmem:[#allocation7 + $0x8] sm:$0xff] %vm138_vm1, %v135_v24 }
 0x109   :  { %226 = shalt.err (!%p223_p6)
}
 0x10a   :  { %s227_s15 = scalar_lea.hbm %s318_s3, 256 }
 0x10b   :  { %p228_p7 = scmp.ne.s32.totalorder %s318_s3, %s227_s15  ;;  %p231_p8 = scmp.lt.u32.totalorder %s227_s15, %s318_s3 }
 0x10d   :  { %p233_p9 = pnand %p231_p8, %p228_p7 }
 0x10f   :  { %236 = shalt.err (!%p233_p9)
}
 0x110   :  { %149 = dma.vmem_to_hbm [thread:$0]  %s147_s12, 256, %s318_s3, [#allocation4]  }
 0x111   :  { %241 = dma.done.wait [#allocation4], 256  }
 0x112   :  { %242 = vsyncadd [#allocation4], 4294967040 }
 0x113   :  { %153 = vsyncpa [#allocation3], 1 }
 0x114   :  { %154 = vsyncpa [#allocation6], 1 }
 0x115   :  { %155 = vsyncpa [#allocation4], 1 }

</bundles_post_ra>
